<compile_context>
chip_gen: v5e
topology: v5e:2x2
jax: 0.10.0
libtpu: 0.0.40
codegen_flags: <defaults>
</compile_context>

<pallas_src>
import jax
import jax.numpy as jnp
from jax.experimental import pallas as pl
from jax.experimental.pallas import tpu as pltpu


def time_embedding_kernel(x_ref, w1_ref, b1_ref, w2_ref, b2_ref, o_ref):
    # linear1: (B, n_embed) @ (n_embed, hidden) + (1, hidden); bf16 in, f32 acc.
    h = jnp.dot(x_ref[...], w1_ref[...], preferred_element_type=jnp.float32)
    h = h + b1_ref[...]
    # SiLU in f32 (EUP sigmoid + VPU mul).
    h = h * jax.nn.sigmoid(h)
    # linear2, this grid step's N tile: (B, hidden) @ (hidden, tn) + (1, tn).
    out = jnp.dot(h.astype(jnp.bfloat16), w2_ref[...],
                  preferred_element_type=jnp.float32)
    out = out + b2_ref[...]
    o_ref[...] = out.astype(o_ref.dtype)


def _pick_n_tile(hidden: int) -> int:
    # Largest lane-dense (multiple of 128) tile that divides hidden. 640 is
    # preferred so hidden=1280 (real SD) -> 2 tiles (one per v7x TensorCore,
    # minimal grid-step overhead, big strided w2 DMA rows). hidden=128 -> 128.
    for cand in (640, 512, 384, 256, 128):
        if hidden % cand == 0:
            return cand
    return hidden  # fallback: single full-width tile (block == full array dim)


def time_embedding(x, w1, b1, w2, b2):
    """x: (B, n_embed); w1: (n_embed, 4n) bf16; b1: (4n,); w2: (4n, 4n) bf16; b2: (4n,).

    Weights are stored pre-transposed as (in_features, out_features) so the
    kernel does plain `x @ W + b` on the MXU. w1/w2 MUST already be bf16
    (cast once at model init) - the kernel is HBM-weight-bound, and a per-call
    f32->bf16 convert would double the HBM traffic it is trying to avoid.
    """
    assert w1.dtype == jnp.bfloat16, "store w1 in bf16 at init (no per-call cast)"
    assert w2.dtype == jnp.bfloat16, "store w2 in bf16 at init (no per-call cast)"

    B, n_embed = x.shape
    hidden = w1.shape[1]
    out_dtype = x.dtype

    # x is tiny (B x n_embed); casting it per call is negligible. Biases in f32.
    x_bf = x.astype(jnp.bfloat16)
    b1_2d = b1.reshape(1, hidden).astype(jnp.float32)
    b2_2d = b2.reshape(1, hidden).astype(jnp.float32)

    tn = _pick_n_tile(hidden)
    grid = (hidden // tn,)

    return pl.pallas_call(
        time_embedding_kernel,
        out_shape=jax.ShapeDtypeStruct((B, hidden), out_dtype),
        grid_spec=pltpu.PrefetchScalarGridSpec(
            num_scalar_prefetch=0,
            grid=grid,
            in_specs=[
                # Resident across the N grid (constant index_map -> DMA'd once).
                pl.BlockSpec((B, n_embed), lambda j: (0, 0)),
                pl.BlockSpec((n_embed, hidden), lambda j: (0, 0)),
                pl.BlockSpec((1, hidden), lambda j: (0, 0)),
                # Streamed per N tile (the dominant w2 read).
                pl.BlockSpec((hidden, tn), lambda j: (0, j)),
                pl.BlockSpec((1, tn), lambda j: (0, j)),
            ],
            out_specs=pl.BlockSpec((B, tn), lambda j: (0, j)),
        ),
        compiler_params=pltpu.CompilerParams(
            dimension_semantics=("parallel",),
        ),
    )(x_bf, w1, b1_2d, w2, b2_2d)


def reference_f32(x, w1, b1, w2, b2):
    h = x @ w1 + b1
    h = h * jax.nn.sigmoid(h)
    return h @ w2 + b2


def reference_bf16(x, w1, b1, w2, b2):
    # Mirrors the kernel's mixed precision: bf16 operands, f32 accumulation,
    # SiLU in f32.
    xb = x.astype(jnp.bfloat16)
    w1b = w1.astype(jnp.bfloat16)
    w2b = w2.astype(jnp.bfloat16)
    h = jnp.dot(xb, w1b, preferred_element_type=jnp.float32) + b1
    h = h * jax.nn.sigmoid(h)
    out = jnp.dot(h.astype(jnp.bfloat16), w2b,
                  preferred_element_type=jnp.float32) + b2
    return out


if __name__ == "__main__":
    key = jax.random.PRNGKey(0)
    n_embed = 32          # SMALL synthetic size (real SD uses 320)
    hidden = 4 * n_embed  # 128
    B = 2

    k_x, k_w1, k_b1, k_w2, k_b2 = jax.random.split(key, 5)
    x = jax.random.normal(k_x, (B, n_embed), dtype=jnp.float32)
    # linear1.weight: (4n, n) -> stored transposed as (n, 4n); bias (4n,)
    w1 = jax.random.normal(k_w1, (n_embed, hidden), dtype=jnp.float32) * 0.02
    b1 = jax.random.normal(k_b1, (hidden,), dtype=jnp.float32) * 0.02
    # linear2.weight: (4n, 4n) -> stored transposed as (4n, 4n); bias (4n,)
    w2 = jax.random.normal(k_w2, (hidden, hidden), dtype=jnp.float32) * 0.02
    b2 = jax.random.normal(k_b2, (hidden,), dtype=jnp.float32) * 0.02

    # One-time "model init" cast: weights live in bf16, biases in f32. This is
    # NOT part of the per-call path.
    w1_bf = jax.block_until_ready(w1.astype(jnp.bfloat16))
    w2_bf = jax.block_until_ready(w2.astype(jnp.bfloat16))
    b1_f = b1.astype(jnp.float32)
    b2_f = b2.astype(jnp.float32)

    out = time_embedding(x, w1_bf, b1_f, w2_bf, b2_f)
    out = jax.block_until_ready(out)
    assert out.shape == (B, hidden), out.shape
    assert out.dtype == x.dtype, out.dtype

    # Tight check against the bf16-matched reference (same precision recipe).
    ref_bf = reference_bf16(x, w1, b1, w2, b2)
    err_bf = float(jnp.max(jnp.abs(out - ref_bf)))
    assert jnp.allclose(out, ref_bf, atol=1e-4, rtol=1e-4), err_bf

    # Loose semantic check against the full-f32 reference (bf16 weight storage
    # introduces ~0.4% relative error on the weights).
    ref_f32 = reference_f32(x, w1, b1, w2, b2)
    err_f32 = float(jnp.max(jnp.abs(out - ref_f32)))
    assert jnp.allclose(out, ref_f32, atol=2e-2, rtol=2e-2), err_f32

    print("KERNEL_OK")
</pallas_src>

<mosaic_0001>
module attributes {stable_mosaic.version = 11 : i64} {
  func.func @time_embedding_kernel(%arg0: i32, %arg1: memref<2x32xbf16, #tpu.memory_space<vmem>>, %arg2: memref<32x128xbf16, #tpu.memory_space<vmem>>, %arg3: memref<1x128xf32, #tpu.memory_space<vmem>>, %arg4: memref<128x128xbf16, #tpu.memory_space<vmem>>, %arg5: memref<1x128xf32, #tpu.memory_space<vmem>>, %arg6: memref<2x128xf32, #tpu.memory_space<vmem>>) attributes {dimension_semantics = [#tpu.dimension_semantics<parallel>], iteration_bounds = array<i64: 1>, scalar_prefetch = 0 : i64, scratch_operands = 0 : i64, tpu.core_type = #tpu.core_type<tc>, window_params = [{pipeline_mode = #tpu.pipeline_mode<synchronous>, transform_indices = @transform_0, window_bounds = array<i64: 2, 32>}, {pipeline_mode = #tpu.pipeline_mode<synchronous>, transform_indices = @transform_1, window_bounds = array<i64: 32, 128>}, {pipeline_mode = #tpu.pipeline_mode<synchronous>, transform_indices = @transform_2, window_bounds = array<i64: 1, 128>}, {transform_indices = @transform_3, window_bounds = array<i64: 128, 128>}, {transform_indices = @transform_4, window_bounds = array<i64: 1, 128>}, {transform_indices = @transform_5, window_bounds = array<i64: 2, 128>}]} {
    %c0 = arith.constant 0 : index
    %c0_0 = arith.constant 0 : index
    %0 = vector.load %arg1[%c0, %c0_0] : memref<2x32xbf16, #tpu.memory_space<vmem>>, vector<2x32xbf16>
    %c0_1 = arith.constant 0 : index
    %c0_2 = arith.constant 0 : index
    %1 = vector.load %arg2[%c0_1, %c0_2] : memref<32x128xbf16, #tpu.memory_space<vmem>>, vector<32x128xbf16>
    %cst = arith.constant dense<0.000000e+00> : vector<2x128xf32>
    %2 = tpu.matmul %0, %1, %cst {dimension_numbers = #tpu.dot_dimension_numbers<[1], [0], [0], [1], [0, 0, 1, 1], [], []>} : vector<2x32xbf16>, vector<32x128xbf16>, vector<2x128xf32> -> vector<2x128xf32>
    %c0_3 = arith.constant 0 : index
    %c0_4 = arith.constant 0 : index
    %3 = vector.load %arg3[%c0_3, %c0_4] : memref<1x128xf32, #tpu.memory_space<vmem>>, vector<1x128xf32>
    %4 = vector.broadcast %3 : vector<1x128xf32> to vector<2x128xf32>
    %5 = arith.addf %2, %4 : vector<2x128xf32>
    %6 = arith.negf %5 : vector<2x128xf32>
    %7 = math.exp %6 : vector<2x128xf32>
    %cst_5 = arith.constant 1.000000e+00 : f32
    %8 = vector.broadcast %cst_5 : f32 to vector<2x128xf32>
    %9 = arith.addf %8, %7 : vector<2x128xf32>
    %10 = arith.divf %8, %9 : vector<2x128xf32>
    %11 = arith.mulf %5, %10 : vector<2x128xf32>
    %12 = arith.truncf %11 : vector<2x128xf32> to vector<2x128xbf16>
    %c0_6 = arith.constant 0 : index
    %c0_7 = arith.constant 0 : index
    %13 = vector.load %arg4[%c0_6, %c0_7] : memref<128x128xbf16, #tpu.memory_space<vmem>>, vector<128x128xbf16>
    %cst_8 = arith.constant dense<0.000000e+00> : vector<2x128xf32>
    %14 = tpu.matmul %12, %13, %cst_8 {dimension_numbers = #tpu.dot_dimension_numbers<[1], [0], [0], [1], [0, 0, 1, 1], [], []>} : vector<2x128xbf16>, vector<128x128xbf16>, vector<2x128xf32> -> vector<2x128xf32>
    %c0_9 = arith.constant 0 : index
    %c0_10 = arith.constant 0 : index
    %15 = vector.load %arg5[%c0_9, %c0_10] : memref<1x128xf32, #tpu.memory_space<vmem>>, vector<1x128xf32>
    %16 = vector.broadcast %15 : vector<1x128xf32> to vector<2x128xf32>
    %17 = arith.addf %14, %16 : vector<2x128xf32>
    %c0_11 = arith.constant 0 : index
    %c0_12 = arith.constant 0 : index
    %18 = vector.load %arg6[%c0_11, %c0_12] : memref<2x128xf32, #tpu.memory_space<vmem>>, vector<2x128xf32>
    tpu.vector_store %arg6[%c0_11, %c0_12], %17 {strides = array<i32>} : memref<2x128xf32, #tpu.memory_space<vmem>>, vector<2x128xf32>,
    return
  }
  func.func @transform_0(%arg0: i32) -> (i32, i32) {
    %c0_i32 = arith.constant 0 : i32
    %c0_i32_0 = arith.constant 0 : i32
    %c0_i32_1 = arith.constant 0 : i32
    return %c0_i32, %c0_i32_0 : i32, i32
  }
  func.func @transform_1(%arg0: i32) -> (i32, i32) {
    %c0_i32 = arith.constant 0 : i32
    %c0_i32_0 = arith.constant 0 : i32
    %c0_i32_1 = arith.constant 0 : i32
    return %c0_i32, %c0_i32_0 : i32, i32
  }
  func.func @transform_2(%arg0: i32) -> (i32, i32) {
    %c0_i32 = arith.constant 0 : i32
    %c0_i32_0 = arith.constant 0 : i32
    %c0_i32_1 = arith.constant 0 : i32
    return %c0_i32, %c0_i32_0 : i32, i32
  }
  func.func @transform_3(%arg0: i32) -> (i32, i32) {
    %c0_i32 = arith.constant 0 : i32
    %c0_i32_0 = arith.constant 0 : i32
    return %c0_i32, %arg0 : i32, i32
  }
  func.func @transform_4(%arg0: i32) -> (i32, i32) {
    %c0_i32 = arith.constant 0 : i32
    %c0_i32_0 = arith.constant 0 : i32
    return %c0_i32, %arg0 : i32, i32
  }
  func.func @transform_5(%arg0: i32) -> (i32, i32) {
    %c0_i32 = arith.constant 0 : i32
    %c0_i32_0 = arith.constant 0 : i32
    return %c0_i32, %arg0 : i32, i32
  }
}

</mosaic_0001>

<bundles_post_ra>
// kernel: tpu_custom_call.1
= control target key start
LH: loop header
LB: loop body
LE: loop exit
PB: predicated region body
PF: predicated region fallthrough
CT: control target
= control target key end

     0   :  { %10 = vsyncpa [#allocation3], 0  ;;  %s446_s0 = inlined_call_operand.hbm [shape: bf16[2,32], index: 0, kind: input, shape index: {}]   ;;  %s447_s1 = inlined_call_operand.hbm [shape: bf16[32,128], index: 1, kind: input, shape index: {}]   ;;  %s448_s2 = inlined_call_operand.vmem [shape: f32[1,128], index: 2, kind: input, shape index: {}]   ;;  %s449_s3 = inlined_call_operand.hbm [shape: bf16[128,128], index: 3, kind: input, shape index: {}]   ;;  %s450_s4 = inlined_call_operand.vmem [shape: f32[1,128], index: 4, kind: input, shape index: {}]   ;;  %s451_s5 = inlined_call_operand.hbm [shape: f32[2,128], index: 5, kind: output, shape index: {}]  }
   0x1   :  { %11 = vsyncpa [#allocation6], 0  ;;  %s28_s20 = sshll.u32 %s447_s1, 4  ;;  %s29_s20 = int_to_ptr.hbm [resolvable:$true] %s28_s20 }
   0x2   :  { %12 = vsyncpa [#allocation4], 0  ;;  %s392_s21 = smov [#allocation5]   ;;  %s18_s25 = sshll.u32 %s446_s0, 4  ;;  %s19_s25 = int_to_ptr.hbm [resolvable:$true] %s18_s25 }
   0x3   :  { %s30_s22 = sshll.u32 %s392_s21, 4  ;;  %s393_s26 = smov 64   ;;  %s31_s22 = int_to_ptr.vmem [resolvable:$true] %s30_s22 }
   0x4   :  { %s394_s27 = smov 4   ;;  %s395_s28 = smov [#allocation2]  }
   0x5   :  { %36 = dma.hbm_to_vmem [thread:$0]  %s29_s20, 256, %s31_s22, [#allocation6], %s393_s26, %s393_s26, %s394_s27  }
   0x6   :  { %s20_s29 = sshll.u32 %s395_s28, 4  ;;  %s43_s7 = sshll.u32 %s449_s3, 4  ;;  %s21_s29 = int_to_ptr.vmem [resolvable:$true] %s20_s29  ;;  %s44_s7 = int_to_ptr.hbm [resolvable:$true] %s43_s7 }
   0x7   :  { %23 = dma.hbm_to_vmem [thread:$0]  %s19_s25, 16, %s21_s29, [#allocation3]  }
   0x8   :  { %s396_s1 = smov [#allocation7]  }
   0x9   :  { %s45_s8 = sshll.u32 %s396_s1, 4  ;;  %s46_s8 = int_to_ptr.vmem [resolvable:$true] %s45_s8 }
   0xa   :  { %51 = dma.hbm_to_vmem [thread:$0]  %s44_s7, 1024, %s46_s8, [#allocation6], %s393_s26, %s393_s26, %s394_s27  }
   0xb   :  { %386 = dma.done.wait [#allocation3], 16  }
   0xc   :  { %387 = vsyncadd [#allocation3], 4294967280 }
   0xd   :  { %388 = dma.done.wait [#allocation6], 1280  }
   0xe   :  { %389 = vsyncadd [#allocation6], 4294966016  ;;  %v269_v0 = vld [vmem:[#allocation5 + $0x8] sm:$0xff]  ;;  %v268_v1 = vld [vmem:[#allocation5] sm:$0xff]  ;;  %vm88_vm0 = vcmask 261120   ;;  %s397_s10 = smov [#allocation8]  }
   0xf   :  { %98 = vmatpush.bf16.msra.mxu0 %v269_v0  ;;  %v67_v2 = vld [vmem:[#allocation2] sm:$0x1]  ;;  %v277_v3 = vld [vmem:[#allocation7 + $0x38] sm:$0xff]  ;;  %v276_v4 = vld [vmem:[#allocation7 + $0x30] sm:$0xff]  ;;  %s213_s11 = sshll.u32 %s397_s10, 4  ;;  %s215_s14 = sshll.u32 %s451_s5, 4  ;;  %s214_s11 = int_to_ptr.vmem [resolvable:$true] %s213_s11  ;;  %s216_s14 = int_to_ptr.hbm [resolvable:$true] %s215_s14 }
  0x10   :  { %194 = vmatpush.bf16.msra.mxu1 %v277_v3  ;;  %v275_v5 = vld [vmem:[#allocation7 + $0x28] sm:$0xff]  ;;  %v274_v6 = vld [vmem:[#allocation7 + $0x20] sm:$0xff]  ;;  %v273_v7 = vld [vmem:[#allocation7 + $0x18] sm:$0xff] }
  0x11   :  { %v272_v8 = vld [vmem:[#allocation7 + $0x10] sm:$0xff]  ;;  %v271_v9 = vld [vmem:[#allocation7 + $0x8] sm:$0xff]  ;;  %v270_v10 = vld [vmem:[#allocation7] sm:$0xff] }
  0x12   :  { %v284_v11 = vld [vmem:[%s448_s2] ss:$0 sm:$0xff] }
  0x13   :  { %99 = vmatpush.bf16.msra.mxu0 %v268_v1  ;;  %v285_v30 = vld [vmem:[%s450_s4] ss:$0 sm:$0xff] }
  0x14   :  { %195 = vmatpush.bf16.msra.mxu1 %v276_v4 }
  0x16   :  { %234 = vmatmul.msk.bf16.vlgmr.msra.gmra.mxu0 %vm88_vm0, %v67_v2 }
  0x18   :  { %196 = vmatpush.bf16.msra.mxu1 %v275_v5 }
  0x1c   :  { %197 = vmatpush.bf16.msra.mxu1 %v274_v6 }
  0x20   :  { %198 = vmatpush.bf16.msra.mxu1 %v273_v7 }
  0x24   :  { %199 = vmatpush.bf16.msra.mxu1 %v272_v8 }
  0x28   :  { %200 = vmatpush.bf16.msra.mxu1 %v271_v9 }
  0x2c   :  { %201 = vmatpush.bf16.msra.mxu1 %v270_v10 }
  0x93   :  { %v101_v12 = vpop.f32.mrf.mxu0 }
  0x94   :  { %v102_v13 = vadd.f32 %v284_v11, %v101_v12 }
  0x96   :  { %v235_v14 = vmul.f32 -1.442695, %v102_v13 }
  0x98   :  { %286 = vpow2.f32 %v235_v14 }
  0x9b   :  { %v103_v15 = vpop.f32.mrf.mxu0 }
  0x9e   :  { %v287_v16 = vpop.eup %286 }
  0x9f   :  { %v108_v17 = vadd.f32 1.0, %v287_v16 }
  0xa1   :  { %288 = vrcp.f32 %v108_v17  ;;  %v120_v21 = vand.u32 2147483648, %v108_v17  ;;  %v118_v23 = vand.u32 2147483647, %v108_v17  ;;  %vm114_vm2 = vweird.f32 %v108_v17 }
  0xa3   :  { %v121_v25 = vor.u32 1.1754944e-38, %v120_v21  ;;  %vm119_vm4 = vcmp.eq.f32.partialorder %v118_v23, 8.507059e+37 }
  0xa7   :  { %v289_v18 = vpop.eup %288 }
  0xa8   :  { %v110_v19 = vmul.f32 %v289_v18, %v108_v17  ;;  %vm115_vm1 = vweird.f32 %v289_v18 }
  0xa9   :  { %vm116_vm3 = vmor %vm114_vm2, %vm115_vm1 }
  0xaa   :  { %v111_v20 = vsub.f32 1.0, %v110_v19 }
  0xac   :  { %v112_v22 = vmul.f32 %v289_v18, %v111_v20 }
  0xae   :  { %v113_v24 = vadd.f32 %v289_v18, %v112_v22 }
  0xb0   :  { %v117_v26 = vsel %vm116_vm3, %v289_v18, %v113_v24 }
  0xb1   :  { %v122_v27 = vsel %vm119_vm4, %v121_v25, %v117_v26 }
  0xb2   :  { %v124_v28 = vmul.f32 %v122_v27, %v102_v13 }
  0xb4   :  { %v125_v29 = vpack.c.bf16 %v124_v28, %v124_v28 }
  0xb6   :  { %202 = vmatmul.bf16.vlgmr.msra.gmra.mxu1 %v125_v29 }
 0x133   :  { %v203_v31 = vpop.f32.mrf.mxu1 }
 0x134   :  { %v204_v32 = vadd.f32 %v285_v30, %v203_v31 }
 0x136   :  { %207 = vst [vmem:[#allocation8] sm:$0x3] %v204_v32 }
 0x137   :  { %218 = dma.vmem_to_hbm [thread:$0]  %s214_s11, 32, %s216_s14, [#allocation4]  }
 0x13b   :  { %v205_v33 = vpop.f32.mrf.mxu1 }
 0x13c   :  { %390 = dma.done.wait [#allocation4], 32  }
 0x13d   :  { %391 = vsyncadd [#allocation4], 4294967264 }
 0x13e   :  { %223 = vsyncpa [#allocation3], 1 }
 0x13f   :  { %224 = vsyncpa [#allocation6], 1 }
 0x140   :  { %225 = vsyncpa [#allocation4], 1 }

</bundles_post_ra>
